<compile_context>
chip_gen: v5e
topology: v5e:2x2
jax: 0.10.0
libtpu: 0.0.40
codegen_flags: <defaults>
</compile_context>

<pallas_src>
import functools

import jax
import jax.numpy as jnp
from jax import lax
from jax.experimental import pallas as pl
from jax.experimental.pallas import tpu as pltpu


# --------------------------------------------------------------------------- #
# Kernel
# --------------------------------------------------------------------------- #
def _margin_ranking_partials_kernel(
        pos_sim_ref, neg_sim_ref, pos_dist_ref, neg_dist_ref,
        pos_sum_ref, neg_sum_ref, max_pos_ref, min_neg_ref,
        *, n_rows, tile_n, acc_rows, blocks_per_part, num_full_tiles,
        needs_mask):
    i = pl.program_id(1)                       # tile index within this partition

    # ---- init the (resident) per-partition output accumulators -------------
    @pl.when(i == 0)
    def _init():
        pos_sum_ref[...] = jnp.zeros_like(pos_sum_ref)
        neg_sum_ref[...] = jnp.zeros_like(neg_sum_ref)
        max_pos_ref[...] = jnp.full_like(max_pos_ref, -jnp.inf)
        min_neg_ref[...] = jnp.full_like(min_neg_ref, jnp.inf)

    d = pos_sim_ref.shape[-1]

    def _accumulate(pos, neg, pd, nd):
        # pos/neg/pd/nd: (tile_n, D) float32
        if acc_rows > 1:
            g = tile_n // acc_rows
            fold = lambda x: x.reshape(g, acc_rows, d)
            pos_s = jnp.sum(fold(pos), axis=0)            # (acc_rows, D)
            neg_s = jnp.sum(fold(neg), axis=0)
            pd_m = jnp.max(fold(pd), axis=0)
            nd_m = jnp.min(fold(nd), axis=0)
        else:
            pos_s = jnp.sum(pos, axis=0, keepdims=True)    # (1, D)
            neg_s = jnp.sum(neg, axis=0, keepdims=True)
            pd_m = jnp.max(pd, axis=0, keepdims=True)
            nd_m = jnp.min(nd, axis=0, keepdims=True)
        pos_sum_ref[0] = pos_sum_ref[0] + pos_s
        neg_sum_ref[0] = neg_sum_ref[0] + neg_s
        max_pos_ref[0] = jnp.maximum(max_pos_ref[0], pd_m)
        min_neg_ref[0] = jnp.minimum(min_neg_ref[0], nd_m)

    pos = pos_sim_ref[...].astype(jnp.float32)
    neg = neg_sim_ref[...].astype(jnp.float32)
    # NOTE: clamp(min=0) is deferred to the wrapper epilogue (commutes with max/min).
    pd = pos_dist_ref[...].astype(jnp.float32)
    nd = neg_dist_ref[...].astype(jnp.float32)

    if not needs_mask:
        # Shapes divide evenly and there are no dummy tiles: mask-free fast path.
        _accumulate(pos, neg, pd, nd)
    else:
        p = pl.program_id(0)
        t = p * blocks_per_part + i            # un-clamped global tile index

        @pl.when(t < num_full_tiles)
        def _full_tile():                      # unmasked fast path
            _accumulate(pos, neg, pd, nd)

        @pl.when(t >= num_full_tiles)
        def _edge_tile():                      # partial / dummy tile: mask rows >= N
            row = t * tile_n + lax.broadcasted_iota(jnp.int32, (tile_n, 1), 0)
            valid = row < n_rows
            _accumulate(jnp.where(valid, pos, 0.0),
                        jnp.where(valid, neg, 0.0),
                        jnp.where(valid, pd, -jnp.inf),
                        jnp.where(valid, nd, jnp.inf))


# --------------------------------------------------------------------------- #
# Tiling / generation heuristics
# --------------------------------------------------------------------------- #
@functools.lru_cache(maxsize=1)
def _generation_params():
    """Per-TPU-generation byte targets, VMEM budgets, and core count."""
    kind = ""
    try:
        kind = (getattr(jax.devices()[0], "device_kind", "") or "").lower()
    except Exception:
        pass
    if "v7" in kind or "tpu7" in kind or "7x" in kind:
        # 2 TCs/chip, ~3.2 TB/s HBM per TC, 64 MiB physical VMEM (32 MiB scoped default).
        return dict(target_step_bytes=8 << 20, vmem_budget_bytes=20 << 20,
                    vmem_limit_bytes=28 << 20, default_partitions=2)
    if "v6" in kind:
        return dict(target_step_bytes=4 << 20, vmem_budget_bytes=24 << 20,
                    vmem_limit_bytes=32 << 20, default_partitions=1)
    if "v5" in kind and ("lite" in kind or "5e" in kind):
        return dict(target_step_bytes=2 << 20, vmem_budget_bytes=12 << 20,
                    vmem_limit_bytes=24 << 20, default_partitions=1)
    # Conservative default for unknown generations.
    return dict(target_step_bytes=2 << 20, vmem_budget_bytes=12 << 20,
                vmem_limit_bytes=24 << 20, default_partitions=1)


def _pick_tile_n(d, itemsize, *, sublane_mult, target_step_bytes,
                 vmem_budget_bytes):
    """Tile rows so that 4 streams move ~target bytes/step and 2x-buffered tiles fit VMEM."""
    bytes_per_row = 4 * d * itemsize                          # 4 input streams
    t_target = max(1, target_step_bytes // bytes_per_row)
    t_vmem = max(1, vmem_budget_bytes // (2 * bytes_per_row))  # double-buffered
    t = min(t_target, t_vmem)
    return max(sublane_mult, (t // sublane_mult) * sublane_mult)


# --------------------------------------------------------------------------- #
# Wrapper
# --------------------------------------------------------------------------- #
def margin_ranking_loss(pos_sim_stacked, neg_sim_stacked,
                        positive_distances, negative_distances,
                        margin=1.0, tile_n=None, n_partitions=None):
    n, d = pos_sim_stacked.shape
    assert neg_sim_stacked.shape == (n, d)
    assert positive_distances.shape == (n, d)
    assert negative_distances.shape == (n, d)

    gen = _generation_params()
    itemsize = pos_sim_stacked.dtype.itemsize
    sublane_mult = max(8, 32 // itemsize)        # 8 f32 / 16 bf16 / 32 int8-fp8

    if tile_n is None:
        tile_n = _pick_tile_n(d, itemsize,
                              sublane_mult=sublane_mult,
                              target_step_bytes=gen["target_step_bytes"],
                              vmem_budget_bytes=gen["vmem_budget_bytes"])
    tile_n = int(tile_n)
    if tile_n >= n:
        tile_n = n                               # single full block (always layout-legal)
    else:
        tile_n = max(sublane_mult, (tile_n // sublane_mult) * sublane_mult)

    grid_n_total = pl.cdiv(n, tile_n)            # tiles over the full N range

    if n_partitions is None:
        n_partitions = gen["default_partitions"]
    num_parts = max(1, min(int(n_partitions), grid_n_total))
    bpp = pl.cdiv(grid_n_total, num_parts)       # tiles per partition

    acc_rows = 8 if tile_n % 8 == 0 else 1       # one-vreg-tall accumulator if possible
    num_full_tiles = n // tile_n
    needs_mask = (n % tile_n != 0) or (num_parts * bpp != grid_n_total)

    if num_parts * bpp == grid_n_total:
        in_index = lambda p, i: (p * bpp + i, 0)
    else:
        last = grid_n_total - 1                  # dummy tiles re-read (and mask out) the last tile
        in_index = lambda p, i: (jnp.minimum(p * bpp + i, last), 0)

    in_spec = pl.BlockSpec((tile_n, d), in_index)
    out_spec = pl.BlockSpec((1, acc_rows, d), lambda p, i: (p, 0, 0))
    part_shape = jax.ShapeDtypeStruct((num_parts, acc_rows, d), jnp.float32)

    kernel = functools.partial(
        _margin_ranking_partials_kernel,
        n_rows=n, tile_n=tile_n, acc_rows=acc_rows,
        blocks_per_part=bpp, num_full_tiles=num_full_tiles,
        needs_mask=needs_mask)

    pos_sum, neg_sum, max_pos, min_neg = pl.pallas_call(
        kernel,
        out_shape=(part_shape, part_shape, part_shape, part_shape),
        grid_spec=pltpu.PrefetchScalarGridSpec(
            num_scalar_prefetch=0,
            grid=(num_parts, bpp),
            in_specs=[in_spec, in_spec, in_spec, in_spec],
            out_specs=(out_spec, out_spec, out_spec, out_spec),
        ),
        compiler_params=pltpu.CompilerParams(
            dimension_semantics=("parallel", "arbitrary"),
            vmem_limit_bytes=gen["vmem_limit_bytes"]),
    )(pos_sim_stacked, neg_sim_stacked, positive_distances, negative_distances)

    # ---- tiny cross-partition / cross-sublane / cross-lane epilogue (XLA) ----
    margin = jnp.float32(margin)
    # Deferred clamp(min=0): max/min commute with the monotone clamp.
    max_pos_d = jnp.maximum(jnp.max(max_pos, axis=(0, 1)), 0.0)     # (D,)
    min_neg_d = jnp.maximum(jnp.min(min_neg, axis=(0, 1)), 0.0)     # (D,)
    inv_nd = jnp.float32(1.0 / (n * d))
    pos_mean = jnp.sum(pos_sum) * inv_nd
    neg_mean = jnp.sum(neg_sum) * inv_nd
    loss_pos = jnp.maximum(jnp.zeros((1,), jnp.float32), margin + pos_mean)
    loss_margin = jnp.mean(jnp.maximum(margin + min_neg_d - max_pos_d, 0.0))
    # PyTorch result has shape (1,) due to broadcasting with torch.zeros(1).
    return loss_pos - neg_mean + loss_margin


# --------------------------------------------------------------------------- #
# Pure-JAX reference (mirrors the PyTorch module)
# --------------------------------------------------------------------------- #
def _reference(pos_sim, neg_sim, pos_dist, neg_dist, margin=1.0):
    pos_sim = pos_sim.astype(jnp.float32)
    neg_sim = neg_sim.astype(jnp.float32)
    pos_dist = jnp.maximum(pos_dist.astype(jnp.float32), 0.0)
    neg_dist = jnp.maximum(neg_dist.astype(jnp.float32), 0.0)
    max_pos = jnp.max(pos_dist, axis=0)
    min_neg = jnp.min(neg_dist, axis=0)
    loss_pos = jnp.maximum(jnp.zeros((1,), jnp.float32), margin + jnp.mean(pos_sim))
    loss_neg = jnp.mean(neg_sim)
    loss_margin = jnp.mean(jnp.maximum(margin + min_neg - max_pos, 0.0))
    return loss_pos - loss_neg + loss_margin


if __name__ == "__main__":
    key = jax.random.PRNGKey(0)
    k1, k2, k3, k4 = jax.random.split(key, 4)

    # Small demo shapes matching the module: 8 stacked samples, feature dim 128.
    N, D = 8, 128
    pos_sim = jax.random.normal(k1, (N, D), dtype=jnp.float32)
    neg_sim = jax.random.normal(k2, (N, D), dtype=jnp.float32)
    pos_dist = jax.random.normal(k3, (N, D), dtype=jnp.float32)
    neg_dist = jax.random.normal(k4, (N, D), dtype=jnp.float32)

    loss = jax.block_until_ready(
        margin_ranking_loss(pos_sim, neg_sim, pos_dist, neg_dist, margin=1.0))
    ref = _reference(pos_sim, neg_sim, pos_dist, neg_dist, margin=1.0)
    assert loss.shape == (1,)
    assert jnp.allclose(loss, ref, atol=1e-5, rtol=1e-5), (loss, ref)

    # Multi-tile + remainder mask + dummy-tile + 2-partition ("parallel") path.
    N2 = 20
    k5, k6, k7, k8 = jax.random.split(jax.random.PRNGKey(1), 4)
    a = jax.random.normal(k5, (N2, D), dtype=jnp.float32)
    b = jax.random.normal(k6, (N2, D), dtype=jnp.float32)
    c = jax.random.normal(k7, (N2, D), dtype=jnp.float32)
    e = jax.random.normal(k8, (N2, D), dtype=jnp.float32)
    loss2 = jax.block_until_ready(
        margin_ranking_loss(a, b, c, e, margin=0.5, tile_n=8, n_partitions=2))
    ref2 = _reference(a, b, c, e, margin=0.5)
    assert jnp.allclose(loss2, ref2, atol=1e-5, rtol=1e-5), (loss2, ref2)

    # bf16 inputs: dtype-aware sublane rounding (16) + in-kernel upcast.
    N3 = 40
    k9, k10, k11, k12 = jax.random.split(jax.random.PRNGKey(2), 4)
    a3 = jax.random.normal(k9, (N3, D), dtype=jnp.bfloat16)
    b3 = jax.random.normal(k10, (N3, D), dtype=jnp.bfloat16)
    c3 = jax.random.normal(k11, (N3, D), dtype=jnp.bfloat16)
    e3 = jax.random.normal(k12, (N3, D), dtype=jnp.bfloat16)
    loss3 = jax.block_until_ready(
        margin_ranking_loss(a3, b3, c3, e3, margin=1.0, tile_n=16, n_partitions=2))
    ref3 = _reference(a3, b3, c3, e3, margin=1.0)
    assert jnp.allclose(loss3, ref3, atol=1e-4, rtol=1e-4), (loss3, ref3)

    # Larger fully-auto path (generation-aware tile sizing, mask-free fast path).
    N4 = 2048
    k13, k14, k15, k16 = jax.random.split(jax.random.PRNGKey(3), 4)
    a4 = jax.random.normal(k13, (N4, D), dtype=jnp.float32)
    b4 = jax.random.normal(k14, (N4, D), dtype=jnp.float32)
    c4 = jax.random.normal(k15, (N4, D), dtype=jnp.float32)
    e4 = jax.random.normal(k16, (N4, D), dtype=jnp.float32)
    loss4 = jax.block_until_ready(margin_ranking_loss(a4, b4, c4, e4, margin=1.0))
    ref4 = _reference(a4, b4, c4, e4, margin=1.0)
    assert jnp.allclose(loss4, ref4, atol=1e-4, rtol=1e-4), (loss4, ref4)

    print("KERNEL_OK")
</pallas_src>

<mosaic_0001>
module attributes {stable_mosaic.version = 11 : i64} {
  func.func @_margin_ranking_partials_kernel(%arg0: i32, %arg1: i32, %arg2: memref<8x128xf32, #tpu.memory_space<vmem>>, %arg3: memref<8x128xf32, #tpu.memory_space<vmem>>, %arg4: memref<8x128xf32, #tpu.memory_space<vmem>>, %arg5: memref<8x128xf32, #tpu.memory_space<vmem>>, %arg6: memref<1x8x128xf32, #tpu.memory_space<vmem>>, %arg7: memref<1x8x128xf32, #tpu.memory_space<vmem>>, %arg8: memref<1x8x128xf32, #tpu.memory_space<vmem>>, %arg9: memref<1x8x128xf32, #tpu.memory_space<vmem>>) attributes {dimension_semantics = [#tpu.dimension_semantics<parallel>, #tpu.dimension_semantics<arbitrary>], iteration_bounds = array<i64: 1, 1>, scalar_prefetch = 0 : i64, scratch_operands = 0 : i64, tpu.core_type = #tpu.core_type<tc>, window_params = [{transform_indices = @transform_0, window_bounds = array<i64: 8, 128>}, {transform_indices = @transform_1, window_bounds = array<i64: 8, 128>}, {transform_indices = @transform_2, window_bounds = array<i64: 8, 128>}, {transform_indices = @transform_3, window_bounds = array<i64: 8, 128>}, {transform_indices = @transform_4, window_bounds = array<i64: 1, 8, 128>}, {transform_indices = @transform_5, window_bounds = array<i64: 1, 8, 128>}, {transform_indices = @transform_6, window_bounds = array<i64: 1, 8, 128>}, {transform_indices = @transform_7, window_bounds = array<i64: 1, 8, 128>}]} {
    %c0_i32 = arith.constant 0 : i32
    %0 = arith.cmpi eq, %arg1, %c0_i32 : i32
    %1 = arith.extui %0 : i1 to i32
    %c0_i32_0 = arith.constant 0 : i32
    %2 = arith.cmpi ne, %1, %c0_i32_0 : i32
    scf.if %2 {
      %cst_35 = arith.constant 0.000000e+00 : f32
      %39 = vector.broadcast %cst_35 : f32 to vector<1x8x128xf32>
      %c0_36 = arith.constant 0 : index
      %c0_37 = arith.constant 0 : index
      %c0_38 = arith.constant 0 : index
      %40 = vector.load %arg6[%c0_36, %c0_37, %c0_38] : memref<1x8x128xf32, #tpu.memory_space<vmem>>, vector<1x8x128xf32>
      tpu.vector_store %arg6[%c0_36, %c0_37, %c0_38], %39 {strides = array<i32>} : memref<1x8x128xf32, #tpu.memory_space<vmem>>, vector<1x8x128xf32>,
      %cst_39 = arith.constant 0.000000e+00 : f32
      %41 = vector.broadcast %cst_39 : f32 to vector<1x8x128xf32>
      %c0_40 = arith.constant 0 : index
      %c0_41 = arith.constant 0 : index
      %c0_42 = arith.constant 0 : index
      %42 = vector.load %arg7[%c0_40, %c0_41, %c0_42] : memref<1x8x128xf32, #tpu.memory_space<vmem>>, vector<1x8x128xf32>
      tpu.vector_store %arg7[%c0_40, %c0_41, %c0_42], %41 {strides = array<i32>} : memref<1x8x128xf32, #tpu.memory_space<vmem>>, vector<1x8x128xf32>,
      %cst_43 = arith.constant 0xFF800000 : f32
      %43 = vector.broadcast %cst_43 : f32 to vector<1x8x128xf32>
      %c0_44 = arith.constant 0 : index
      %c0_45 = arith.constant 0 : index
      %c0_46 = arith.constant 0 : index
      %44 = vector.load %arg8[%c0_44, %c0_45, %c0_46] : memref<1x8x128xf32, #tpu.memory_space<vmem>>, vector<1x8x128xf32>
      tpu.vector_store %arg8[%c0_44, %c0_45, %c0_46], %43 {strides = array<i32>} : memref<1x8x128xf32, #tpu.memory_space<vmem>>, vector<1x8x128xf32>,
      %cst_47 = arith.constant 0x7F800000 : f32
      %45 = vector.broadcast %cst_47 : f32 to vector<1x8x128xf32>
      %c0_48 = arith.constant 0 : index
      %c0_49 = arith.constant 0 : index
      %c0_50 = arith.constant 0 : index
      %46 = vector.load %arg9[%c0_48, %c0_49, %c0_50] : memref<1x8x128xf32, #tpu.memory_space<vmem>>, vector<1x8x128xf32>
      tpu.vector_store %arg9[%c0_48, %c0_49, %c0_50], %45 {strides = array<i32>} : memref<1x8x128xf32, #tpu.memory_space<vmem>>, vector<1x8x128xf32>,
    } else {
    }
    %c0 = arith.constant 0 : index
    %c0_1 = arith.constant 0 : index
    %3 = vector.load %arg2[%c0, %c0_1] : memref<8x128xf32, #tpu.memory_space<vmem>>, vector<8x128xf32>
    %c0_2 = arith.constant 0 : index
    %c0_3 = arith.constant 0 : index
    %4 = vector.load %arg3[%c0_2, %c0_3] : memref<8x128xf32, #tpu.memory_space<vmem>>, vector<8x128xf32>
    %c0_4 = arith.constant 0 : index
    %c0_5 = arith.constant 0 : index
    %5 = vector.load %arg4[%c0_4, %c0_5] : memref<8x128xf32, #tpu.memory_space<vmem>>, vector<8x128xf32>
    %c0_6 = arith.constant 0 : index
    %c0_7 = arith.constant 0 : index
    %6 = vector.load %arg5[%c0_6, %c0_7] : memref<8x128xf32, #tpu.memory_space<vmem>>, vector<8x128xf32>
    %7 = vector.shape_cast %3 : vector<8x128xf32> to vector<1x8x128xf32>
    %cst = arith.constant dense<0.000000e+00> : vector<8x128xf32>
    %8 = vector.multi_reduction <add>, %7, %cst [0] : vector<1x8x128xf32> to vector<8x128xf32>
    %9 = vector.shape_cast %4 : vector<8x128xf32> to vector<1x8x128xf32>
    %cst_8 = arith.constant dense<0.000000e+00> : vector<8x128xf32>
    %10 = vector.multi_reduction <add>, %9, %cst_8 [0] : vector<1x8x128xf32> to vector<8x128xf32>
    %11 = vector.shape_cast %5 : vector<8x128xf32> to vector<1x8x128xf32>
    %cst_9 = arith.constant dense<0xFF800000> : vector<8x128xf32>
    %12 = vector.multi_reduction <maximumf>, %11, %cst_9 [0] : vector<1x8x128xf32> to vector<8x128xf32>
    %13 = vector.shape_cast %6 : vector<8x128xf32> to vector<1x8x128xf32>
    %cst_10 = arith.constant dense<0x7F800000> : vector<8x128xf32>
    %14 = vector.multi_reduction <minimumf>, %13, %cst_10 [0] : vector<1x8x128xf32> to vector<8x128xf32>
    %c0_11 = arith.constant 0 : index
    %c0_12 = arith.constant 0 : index
    %c0_13 = arith.constant 0 : index
    %15 = vector.load %arg6[%c0_11, %c0_12, %c0_13] : memref<1x8x128xf32, #tpu.memory_space<vmem>>, vector<1x8x128xf32>
    %16 = vector.shape_cast %15 : vector<1x8x128xf32> to vector<8x128xf32>
    %17 = arith.addf %16, %8 : vector<8x128xf32>
    %c0_14 = arith.constant 0 : index
    %c0_15 = arith.constant 0 : index
    %c0_16 = arith.constant 0 : index
    %18 = vector.load %arg6[%c0_14, %c0_15, %c0_16] : memref<1x8x128xf32, #tpu.memory_space<vmem>>, vector<1x8x128xf32>
    %19 = vector.shape_cast %18 : vector<1x8x128xf32> to vector<8x128xf32>
    %20 = vector.shape_cast %17 : vector<8x128xf32> to vector<1x8x128xf32>
    tpu.vector_store %arg6[%c0_14, %c0_15, %c0_16], %20 {strides = array<i32>} : memref<1x8x128xf32, #tpu.memory_space<vmem>>, vector<1x8x128xf32>,
    %c0_17 = arith.constant 0 : index
    %c0_18 = arith.constant 0 : index
    %c0_19 = arith.constant 0 : index
    %21 = vector.load %arg7[%c0_17, %c0_18, %c0_19] : memref<1x8x128xf32, #tpu.memory_space<vmem>>, vector<1x8x128xf32>
    %22 = vector.shape_cast %21 : vector<1x8x128xf32> to vector<8x128xf32>
    %23 = arith.addf %22, %10 : vector<8x128xf32>
    %c0_20 = arith.constant 0 : index
    %c0_21 = arith.constant 0 : index
    %c0_22 = arith.constant 0 : index
    %24 = vector.load %arg7[%c0_20, %c0_21, %c0_22] : memref<1x8x128xf32, #tpu.memory_space<vmem>>, vector<1x8x128xf32>
    %25 = vector.shape_cast %24 : vector<1x8x128xf32> to vector<8x128xf32>
    %26 = vector.shape_cast %23 : vector<8x128xf32> to vector<1x8x128xf32>
    tpu.vector_store %arg7[%c0_20, %c0_21, %c0_22], %26 {strides = array<i32>} : memref<1x8x128xf32, #tpu.memory_space<vmem>>, vector<1x8x128xf32>,
    %c0_23 = arith.constant 0 : index
    %c0_24 = arith.constant 0 : index
    %c0_25 = arith.constant 0 : index
    %27 = vector.load %arg8[%c0_23, %c0_24, %c0_25] : memref<1x8x128xf32, #tpu.memory_space<vmem>>, vector<1x8x128xf32>
    %28 = vector.shape_cast %27 : vector<1x8x128xf32> to vector<8x128xf32>
    %29 = arith.maximumf %28, %12 : vector<8x128xf32>
    %c0_26 = arith.constant 0 : index
    %c0_27 = arith.constant 0 : index
    %c0_28 = arith.constant 0 : index
    %30 = vector.load %arg8[%c0_26, %c0_27, %c0_28] : memref<1x8x128xf32, #tpu.memory_space<vmem>>, vector<1x8x128xf32>
    %31 = vector.shape_cast %30 : vector<1x8x128xf32> to vector<8x128xf32>
    %32 = vector.shape_cast %29 : vector<8x128xf32> to vector<1x8x128xf32>
    tpu.vector_store %arg8[%c0_26, %c0_27, %c0_28], %32 {strides = array<i32>} : memref<1x8x128xf32, #tpu.memory_space<vmem>>, vector<1x8x128xf32>,
    %c0_29 = arith.constant 0 : index
    %c0_30 = arith.constant 0 : index
    %c0_31 = arith.constant 0 : index
    %33 = vector.load %arg9[%c0_29, %c0_30, %c0_31] : memref<1x8x128xf32, #tpu.memory_space<vmem>>, vector<1x8x128xf32>
    %34 = vector.shape_cast %33 : vector<1x8x128xf32> to vector<8x128xf32>
    %35 = arith.minimumf %34, %14 : vector<8x128xf32>
    %c0_32 = arith.constant 0 : index
    %c0_33 = arith.constant 0 : index
    %c0_34 = arith.constant 0 : index
    %36 = vector.load %arg9[%c0_32, %c0_33, %c0_34] : memref<1x8x128xf32, #tpu.memory_space<vmem>>, vector<1x8x128xf32>
    %37 = vector.shape_cast %36 : vector<1x8x128xf32> to vector<8x128xf32>
    %38 = vector.shape_cast %35 : vector<8x128xf32> to vector<1x8x128xf32>
    tpu.vector_store %arg9[%c0_32, %c0_33, %c0_34], %38 {strides = array<i32>} : memref<1x8x128xf32, #tpu.memory_space<vmem>>, vector<1x8x128xf32>,
    return
  }
  func.func @transform_0(%arg0: i32, %arg1: i32) -> (i32, i32) {
    %c1_i32 = arith.constant 1 : i32
    %0 = arith.muli %arg0, %c1_i32 : i32
    %1 = arith.addi %0, %arg1 : i32
    %c0_i32 = arith.constant 0 : i32
    %c0_i32_0 = arith.constant 0 : i32
    return %1, %c0_i32 : i32, i32
  }
  func.func @transform_1(%arg0: i32, %arg1: i32) -> (i32, i32) {
    %c1_i32 = arith.constant 1 : i32
    %0 = arith.muli %arg0, %c1_i32 : i32
    %1 = arith.addi %0, %arg1 : i32
    %c0_i32 = arith.constant 0 : i32
    %c0_i32_0 = arith.constant 0 : i32
    return %1, %c0_i32 : i32, i32
  }
  func.func @transform_2(%arg0: i32, %arg1: i32) -> (i32, i32) {
    %c1_i32 = arith.constant 1 : i32
    %0 = arith.muli %arg0, %c1_i32 : i32
    %1 = arith.addi %0, %arg1 : i32
    %c0_i32 = arith.constant 0 : i32
    %c0_i32_0 = arith.constant 0 : i32
    return %1, %c0_i32 : i32, i32
  }
  func.func @transform_3(%arg0: i32, %arg1: i32) -> (i32, i32) {
    %c1_i32 = arith.constant 1 : i32
    %0 = arith.muli %arg0, %c1_i32 : i32
    %1 = arith.addi %0, %arg1 : i32
    %c0_i32 = arith.constant 0 : i32
    %c0_i32_0 = arith.constant 0 : i32
    return %1, %c0_i32 : i32, i32
  }
  func.func @transform_4(%arg0: i32, %arg1: i32) -> (i32, i32, i32) {
    %c0_i32 = arith.constant 0 : i32
    %c0_i32_0 = arith.constant 0 : i32
    %c0_i32_1 = arith.constant 0 : i32
    return %arg0, %c0_i32, %c0_i32_0 : i32, i32, i32
  }
  func.func @transform_5(%arg0: i32, %arg1: i32) -> (i32, i32, i32) {
    %c0_i32 = arith.constant 0 : i32
    %c0_i32_0 = arith.constant 0 : i32
    %c0_i32_1 = arith.constant 0 : i32
    return %arg0, %c0_i32, %c0_i32_0 : i32, i32, i32
  }
  func.func @transform_6(%arg0: i32, %arg1: i32) -> (i32, i32, i32) {
    %c0_i32 = arith.constant 0 : i32
    %c0_i32_0 = arith.constant 0 : i32
    %c0_i32_1 = arith.constant 0 : i32
    return %arg0, %c0_i32, %c0_i32_0 : i32, i32, i32
  }
  func.func @transform_7(%arg0: i32, %arg1: i32) -> (i32, i32, i32) {
    %c0_i32 = arith.constant 0 : i32
    %c0_i32_0 = arith.constant 0 : i32
    %c0_i32_1 = arith.constant 0 : i32
    return %arg0, %c0_i32, %c0_i32_0 : i32, i32, i32
  }
}

</mosaic_0001>

<bundles_post_ra>
// kernel: tpu_custom_call.1
= control target key start
LH: loop header
LB: loop body
LE: loop exit
PB: predicated region body
PF: predicated region fallthrough
CT: control target
= control target key end

     0   :  { %13 = vsyncpa [#allocation3], 0  ;;  %s474_s0 = inlined_call_operand.hbm [shape: f32[8,128], index: 0, kind: input, shape index: {}]   ;;  %s475_s1 = inlined_call_operand.hbm [shape: f32[8,128], index: 1, kind: input, shape index: {}]   ;;  %s476_s2 = inlined_call_operand.hbm [shape: f32[8,128], index: 2, kind: input, shape index: {}]   ;;  %s477_s3 = inlined_call_operand.hbm [shape: f32[8,128], index: 3, kind: input, shape index: {}]   ;;  %s478_s4 = inlined_call_operand.hbm [shape: f32[1,8,128], index: 4, kind: output, shape index: {0}]   ;;  %s479_s5 = inlined_call_operand.hbm [shape: f32[1,8,128], index: 5, kind: output, shape index: {1}]   ;;  %s480_s6 = inlined_call_operand.hbm [shape: f32[1,8,128], index: 6, kind: output, shape index: {2}]   ;;  %s481_s7 = inlined_call_operand.hbm [shape: f32[1,8,128], index: 7, kind: output, shape index: {3}]  }
   0x1   :  { %14 = vsyncpa [#allocation6], 0 }
   0x2   :  { %15 = vsyncpa [#allocation9], 0 }
   0x3   :  { %16 = vsyncpa [#allocation4], 0 }
   0x4   :  { %17 = vsyncpa [#allocation12], 0  ;;  %s41_s26 = sshll.u32 %s475_s1, 4  ;;  %s42_s26 = int_to_ptr.hbm [resolvable:$true] %s41_s26 }
   0x5   :  { %18 = vsyncpa [#allocation15], 0  ;;  %s402_s27 = smov [#allocation5]   ;;  %s27_s8 = sshll.u32 %s474_s0, 4  ;;  %s28_s8 = int_to_ptr.hbm [resolvable:$true] %s27_s8 }
   0x6   :  { %s43_s28 = sshll.u32 %s402_s27, 4  ;;  %s403_s9 = smov [#allocation2]   ;;  %s44_s28 = int_to_ptr.vmem [resolvable:$true] %s43_s28 }
   0x7   :  { %46 = dma.hbm_to_vmem [thread:$0]  %s42_s26, 128, %s44_s28, [#allocation6]  }
   0x8   :  { %s29_s10 = sshll.u32 %s403_s9, 4  ;;  %s55_s13 = sshll.u32 %s476_s2, 4  ;;  %s30_s10 = int_to_ptr.vmem [resolvable:$true] %s29_s10  ;;  %s56_s13 = int_to_ptr.hbm [resolvable:$true] %s55_s13 }
   0x9   :  { %32 = dma.hbm_to_vmem [thread:$0]  %s28_s8, 128, %s30_s10, [#allocation3]  }
   0xa   :  { %s69_s15 = sshll.u32 %s477_s3, 4  ;;  %s404_s16 = smov [#allocation7]   ;;  %s70_s15 = int_to_ptr.hbm [resolvable:$true] %s69_s15 }
   0xb   :  { %s57_s17 = sshll.u32 %s404_s16, 4  ;;  %s405_s0 = smov [#allocation8]   ;;  %s58_s17 = int_to_ptr.vmem [resolvable:$true] %s57_s17 }
   0xc   :  { %60 = dma.hbm_to_vmem [thread:$0]  %s56_s13, 128, %s58_s17, [#allocation6]  }
   0xd   :  { %s71_s18 = sshll.u32 %s405_s0, 4  ;;  %s72_s18 = int_to_ptr.vmem [resolvable:$true] %s71_s18 }
   0xe   :  { %74 = dma.hbm_to_vmem [thread:$0]  %s70_s15, 128, %s72_s18, [#allocation9]  }
   0xf   :  { %390 = dma.done.wait [#allocation3], 128  }
  0x10   :  { %391 = vsyncadd [#allocation3], 4294967168 }
  0x11   :  { %392 = dma.done.wait [#allocation6], 256  }
  0x12   :  { %393 = vsyncadd [#allocation6], 4294967040 }
  0x13   :  { %394 = dma.done.wait [#allocation9], 128  }
  0x14   :  { %395 = vsyncadd [#allocation9], 4294967168  ;;  %s406_s2 = smov [#allocation11]   ;;  %s139_s3 = sshll.u32 %s479_s5, 4  ;;  %v104_v0 = vld [vmem:[#allocation5] sm:$0xff]  ;;  %v103_v1 = vld [vmem:[#allocation2] sm:$0xff]  ;;  %s140_s3 = int_to_ptr.hbm [resolvable:$true] %s139_s3 }
  0x15   :  { %s137_s19 = sshll.u32 %s406_s2, 4  ;;  %s128_s24 = sshll.u32 %s478_s4, 4  ;;  %v105_v2 = vld [vmem:[#allocation7] sm:$0xff]  ;;  %v106_v3 = vld [vmem:[#allocation8] sm:$0xff]  ;;  %114 = vst [vmem:[#allocation11] sm:$0xff] %v104_v0  ;;  %s138_s19 = int_to_ptr.vmem [resolvable:$true] %s137_s19  ;;  %s129_s24 = int_to_ptr.hbm [resolvable:$true] %s128_s24 }
  0x16   :  { %s407_s25 = smov [#allocation10]   ;;  %s408_s27 = smov [#allocation13]   ;;  %111 = vst [vmem:[#allocation10] sm:$0xff] %v103_v1 }
  0x17   :  { %s126_s26 = sshll.u32 %s407_s25, 4  ;;  %s148_s28 = sshll.u32 %s408_s27, 4  ;;  %117 = vst [vmem:[#allocation13] sm:$0xff] %v105_v2  ;;  %s127_s26 = int_to_ptr.vmem [resolvable:$true] %s126_s26  ;;  %s149_s28 = int_to_ptr.vmem [resolvable:$true] %s148_s28 }
  0x18   :  { %s150_s8 = sshll.u32 %s480_s6, 4  ;;  %s161_s4 = sshll.u32 %s481_s7, 4  ;;  %120 = vst [vmem:[#allocation14] sm:$0xff] %v106_v3  ;;  %s151_s8 = int_to_ptr.hbm [resolvable:$true] %s150_s8  ;;  %s162_s4 = int_to_ptr.hbm [resolvable:$true] %s161_s4 }
  0x19   :  { %s409_s10 = smov [#allocation14]  }
  0x1a   :  { %s159_s11 = sshll.u32 %s409_s10, 4  ;;  %s160_s11 = int_to_ptr.vmem [resolvable:$true] %s159_s11 }
  0x1b   :  { %142 = dma.vmem_to_hbm [thread:$0]  %s138_s19, 128, %s140_s3, [#allocation12]  }
  0x1c   :  { %131 = dma.vmem_to_hbm [thread:$0]  %s127_s26, 128, %s129_s24, [#allocation4]  }
  0x1d   :  { %153 = dma.vmem_to_hbm [thread:$0]  %s149_s28, 128, %s151_s8, [#allocation12]  }
  0x1e   :  { %164 = dma.vmem_to_hbm [thread:$0]  %s160_s11, 128, %s162_s4, [#allocation15]  }
  0x1f   :  { %396 = dma.done.wait [#allocation4], 128  }
  0x20   :  { %397 = vsyncadd [#allocation4], 4294967168 }
  0x21   :  { %398 = dma.done.wait [#allocation12], 256  }
  0x22   :  { %399 = vsyncadd [#allocation12], 4294967040 }
  0x23   :  { %400 = dma.done.wait [#allocation15], 128  }
  0x24   :  { %401 = vsyncadd [#allocation15], 4294967168 }
  0x25   :  { %181 = vsyncpa [#allocation3], 1 }
  0x26   :  { %182 = vsyncpa [#allocation6], 1 }
  0x27   :  { %183 = vsyncpa [#allocation9], 1 }
  0x28   :  { %184 = vsyncpa [#allocation4], 1 }
  0x29   :  { %185 = vsyncpa [#allocation12], 1 }
  0x2a   :  { %186 = vsyncpa [#allocation15], 1 }

</bundles_post_ra>
